<compile_context>
chip_gen: v7x
topology: tpu7x:2x2x1
jax: 0.10.0
libtpu: 0.0.40
codegen_flags: <defaults>
</compile_context>

<pallas_src>
import functools

import jax
import jax.numpy as jnp
from jax.experimental import pallas as pl
from jax.experimental.pallas import tpu as pltpu


def _bbb_kernel(x_ref, wm_ref, ws2_ref, bm_ref, bs2_ref, eps_ref, o_ref, *, inv_mc):
    x = x_ref[...]                                                 # (C, Ts) f32
    # Mean path: 1x1 conv == (O, C) @ (C, Ts) on the MXU, plus bias mean.
    mean = jnp.dot(wm_ref[...], x, preferred_element_type=jnp.float32) + bm_ref[...]
    # Variance path: clamp(W_std^2) @ clamp(x^2) + clamp(b_std^2).
    x2 = jnp.maximum(x * x, 1e-4)
    var = jnp.dot(ws2_ref[...], x2, preferred_element_type=jnp.float32) + bs2_ref[...]
    # Reparameterized sample, scaled by 1/mc_sample.  Output tile is (O, Ts):
    # spatial lanes -> lane-dense unmasked stores.
    o_ref[...] = (mean + jnp.sqrt(var) * eps_ref[...]) * inv_mc


def _choose_spatial_tile(hw, c, o, vmem_budget_bytes=16 * 1024 * 1024):
    """Largest spatial tile that is HW itself or a 128-multiple divisor of HW,
    keeping double-buffered x/eps/out f32 tiles under the VMEM budget
    (budget chosen to fit even v5e's 16 MiB default scoped VMEM)."""
    bytes_per_col = 2 * 4 * (c + 2 * o)          # 2x buffering, f32, x + eps + out
    cap = max(128, vmem_budget_bytes // bytes_per_col)
    if hw <= cap:
        return hw                                 # whole spatial row per step
    t = min((cap // 128) * 128, (hw // 128) * 128)
    while t >= 128:
        if hw % t == 0:
            return t
        t -= 128
    return hw                                     # no 128-multiple divisor: full row


def bbb_linear2d_forward(x_nchw, w_mean, w_std, b_mean, b_std, eps_nchw,
                         *, mc_sample=1, spatial_tile=None):
    """Forward pass of BBBLinear2d ('activations' sampling).

    x_nchw:   (N, C, H, W) float32
    w_mean:   (O, C) float32   (GaussianParameter.mean)
    w_std:    (O, C) float32   (GaussianParameter.std)
    b_mean:   (O,)   float32
    b_std:    (O,)   float32
    eps_nchw: (N, O, H, W) float32 standard normal (same layout as the
              activation mean, matching normal_like(activation_mean))
    returns:  (N, O, H, W) float32
    """
    N, C, H, W = x_nchw.shape
    O = w_mean.shape[0]
    HW = H * W
    assert eps_nchw.shape == (N, O, H, W)

    ts = spatial_tile if spatial_tile is not None else _choose_spatial_tile(HW, C, O)
    assert ts == HW or (HW % ts == 0 and ts % 128 == 0), (
        "spatial tile must be HW or a 128-multiple divisor of HW")

    # Free reshapes (merge trailing dims) — no data movement, no transposes.
    x3 = x_nchw.reshape(N, C, HW).astype(jnp.float32)
    e3 = eps_nchw.reshape(N, O, HW).astype(jnp.float32)

    wm = w_mean.astype(jnp.float32)                                   # (O, C)
    ws2 = jnp.maximum(w_std.astype(jnp.float32) ** 2, 1e-4)           # (O, C)
    bm = b_mean.astype(jnp.float32).reshape(O, 1)
    bs2 = jnp.maximum(b_std.astype(jnp.float32) ** 2, 1e-4).reshape(O, 1)

    kernel = functools.partial(_bbb_kernel, inv_mc=1.0 / float(mc_sample))

    out3 = pl.pallas_call(
        kernel,
        out_shape=jax.ShapeDtypeStruct((N, O, HW), jnp.float32),
        grid=(N, HW // ts),
        in_specs=[
            # x tile straight from NCHW: (C, Ts), spatial on lanes.
            pl.BlockSpec((None, C, ts), lambda n, s: (n, 0, s)),
            # Weights/biases are tiny and revisited (constant index_map) —
            # resident in VMEM across the whole grid.
            pl.BlockSpec((O, C), lambda n, s: (0, 0)),   # W_mean
            pl.BlockSpec((O, C), lambda n, s: (0, 0)),   # clamp(W_std^2)
            pl.BlockSpec((O, 1), lambda n, s: (0, 0)),   # bias mean
            pl.BlockSpec((O, 1), lambda n, s: (0, 0)),   # clamp(bias_std^2)
            # epsilon tile in the same (O, Ts) layout as the output.
            pl.BlockSpec((None, O, ts), lambda n, s: (n, 0, s)),
        ],
        out_specs=pl.BlockSpec((None, O, ts), lambda n, s: (n, 0, s)),
        compiler_params=pltpu.CompilerParams(
            dimension_semantics=("parallel", "parallel"),
            vmem_limit_bytes=48 * 1024 * 1024),
    )(x3, wm, ws2, bm, bs2, e3)

    # Free reshape back to NCHW.
    return out3.reshape(N, O, H, W)


def _reference(x_nchw, w_mean, w_std, b_mean, b_std, eps_nchw, mc_sample=1):
    N, C, H, W = x_nchw.shape
    O = w_mean.shape[0]
    xf = x_nchw.reshape(N, C, H * W)
    mean = jnp.einsum('oc,ncs->nos', w_mean, xf) + b_mean[None, :, None]
    var = (jnp.einsum('oc,ncs->nos', jnp.maximum(w_std ** 2, 1e-4),
                      jnp.maximum(xf ** 2, 1e-4))
           + jnp.maximum(b_std ** 2, 1e-4)[None, :, None])
    out = (mean + jnp.sqrt(var) * eps_nchw.reshape(N, O, H * W)) / mc_sample
    return out.reshape(N, O, H, W)


if __name__ == "__main__":
    key = jax.random.PRNGKey(0)
    k_x, k_wm, k_bm, k_eps = jax.random.split(key, 4)

    # Small shapes consistent with the module (1x1 conv over channels).
    N, C, H, W = 2, 4, 16, 16
    O = 8
    mc_sample = 1

    x = jax.random.normal(k_x, (N, C, H, W), dtype=jnp.float32)

    # Deterministic "blundell_init"-style parameters: mean ~ N(0, 0.1),
    # std = softplus(rho) with rho = -3 (constant).
    w_mean = 0.1 * jax.random.normal(k_wm, (O, C), dtype=jnp.float32)
    w_std = jnp.full((O, C), jnp.log1p(jnp.exp(-3.0)), dtype=jnp.float32)
    b_mean = 0.1 * jax.random.normal(k_bm, (O,), dtype=jnp.float32)
    b_std = jnp.full((O,), jnp.log1p(jnp.exp(-3.0)), dtype=jnp.float32)

    # Training-path epsilon: standard normal with the activation shape
    # (N, O, H, W), exactly like normal_like(activation_mean) in the module.
    eps = jax.random.normal(k_eps, (N, O, H, W), dtype=jnp.float32)

    # TODO(synk): weight_prior/bias_prior KL divergence not implemented (priors
    # are external objects; KL does not affect the returned forward output).
    # TODO(synk): epsilon is passed in explicitly (host RNG) rather than drawn
    # in-kernel with pltpu.prng_* so the output stays checkable against a
    # pure-JAX reference; swap to in-kernel PRNG to save one (M*O*4B) HBM read.

    out = bbb_linear2d_forward(x, w_mean, w_std, b_mean, b_std, eps,
                               mc_sample=mc_sample)
    out = jax.block_until_ready(out)

    ref = _reference(x, w_mean, w_std, b_mean, b_std, eps, mc_sample)
    assert out.shape == (N, O, H, W)
    assert jnp.allclose(out, ref, atol=1e-5, rtol=1e-5)

    print("KERNEL_OK")
</pallas_src>

<mosaic_0001>
module attributes {stable_mosaic.version = 11 : i64} {
  func.func @_bbb_kernel(%arg0: i32, %arg1: i32, %arg2: memref<1x4x256xf32, #tpu.memory_space<vmem>>, %arg3: memref<8x4xf32, #tpu.memory_space<vmem>>, %arg4: memref<8x4xf32, #tpu.memory_space<vmem>>, %arg5: memref<8x1xf32, #tpu.memory_space<vmem>>, %arg6: memref<8x1xf32, #tpu.memory_space<vmem>>, %arg7: memref<1x8x256xf32, #tpu.memory_space<vmem>>, %arg8: memref<1x8x256xf32, #tpu.memory_space<vmem>>) attributes {dimension_semantics = [#tpu.dimension_semantics<parallel>, #tpu.dimension_semantics<parallel>], iteration_bounds = array<i64: 2, 1>, scalar_prefetch = 0 : i64, scratch_operands = 0 : i64, tpu.core_type = #tpu.core_type<tc>, window_params = [{transform_indices = @transform_0, window_bounds = array<i64: 1, 4, 256>}, {pipeline_mode = #tpu.pipeline_mode<synchronous>, transform_indices = @transform_1, window_bounds = array<i64: 8, 4>}, {pipeline_mode = #tpu.pipeline_mode<synchronous>, transform_indices = @transform_2, window_bounds = array<i64: 8, 4>}, {pipeline_mode = #tpu.pipeline_mode<synchronous>, transform_indices = @transform_3, window_bounds = array<i64: 8, 1>}, {pipeline_mode = #tpu.pipeline_mode<synchronous>, transform_indices = @transform_4, window_bounds = array<i64: 8, 1>}, {transform_indices = @transform_5, window_bounds = array<i64: 1, 8, 256>}, {transform_indices = @transform_6, window_bounds = array<i64: 1, 8, 256>}]} {
    %c0 = arith.constant 0 : index
    %c0_0 = arith.constant 0 : index
    %c0_1 = arith.constant 0 : index
    %0 = vector.load %arg2[%c0, %c0_0, %c0_1] : memref<1x4x256xf32, #tpu.memory_space<vmem>>, vector<1x4x256xf32>
    %1 = vector.shape_cast %0 : vector<1x4x256xf32> to vector<4x256xf32>
    %c0_2 = arith.constant 0 : index
    %c0_3 = arith.constant 0 : index
    %2 = vector.load %arg3[%c0_2, %c0_3] : memref<8x4xf32, #tpu.memory_space<vmem>>, vector<8x4xf32>
    %cst = arith.constant dense<0.000000e+00> : vector<8x256xf32>
    %3 = tpu.matmul %2, %1, %cst {dimension_numbers = #tpu.dot_dimension_numbers<[1], [0], [0], [1], [0, 0, 1, 1], [], []>} : vector<8x4xf32>, vector<4x256xf32>, vector<8x256xf32> -> vector<8x256xf32>
    %c0_4 = arith.constant 0 : index
    %c0_5 = arith.constant 0 : index
    %4 = vector.load %arg5[%c0_4, %c0_5] : memref<8x1xf32, #tpu.memory_space<vmem>>, vector<8x1xf32>
    %5 = vector.broadcast %4 : vector<8x1xf32> to vector<8x256xf32>
    %6 = arith.addf %3, %5 : vector<8x256xf32>
    %7 = arith.mulf %1, %1 : vector<4x256xf32>
    %cst_6 = arith.constant 9.99999974E-5 : f32
    %8 = vector.broadcast %cst_6 : f32 to vector<4x256xf32>
    %9 = arith.maximumf %7, %8 : vector<4x256xf32>
    %c0_7 = arith.constant 0 : index
    %c0_8 = arith.constant 0 : index
    %10 = vector.load %arg4[%c0_7, %c0_8] : memref<8x4xf32, #tpu.memory_space<vmem>>, vector<8x4xf32>
    %cst_9 = arith.constant dense<0.000000e+00> : vector<8x256xf32>
    %11 = tpu.matmul %10, %9, %cst_9 {dimension_numbers = #tpu.dot_dimension_numbers<[1], [0], [0], [1], [0, 0, 1, 1], [], []>} : vector<8x4xf32>, vector<4x256xf32>, vector<8x256xf32> -> vector<8x256xf32>
    %c0_10 = arith.constant 0 : index
    %c0_11 = arith.constant 0 : index
    %12 = vector.load %arg6[%c0_10, %c0_11] : memref<8x1xf32, #tpu.memory_space<vmem>>, vector<8x1xf32>
    %13 = vector.broadcast %12 : vector<8x1xf32> to vector<8x256xf32>
    %14 = arith.addf %11, %13 : vector<8x256xf32>
    %15 = math.sqrt %14 : vector<8x256xf32>
    %c0_12 = arith.constant 0 : index
    %c0_13 = arith.constant 0 : index
    %c0_14 = arith.constant 0 : index
    %16 = vector.load %arg7[%c0_12, %c0_13, %c0_14] : memref<1x8x256xf32, #tpu.memory_space<vmem>>, vector<1x8x256xf32>
    %17 = vector.shape_cast %16 : vector<1x8x256xf32> to vector<8x256xf32>
    %18 = arith.mulf %15, %17 : vector<8x256xf32>
    %19 = arith.addf %6, %18 : vector<8x256xf32>
    %cst_15 = arith.constant 1.000000e+00 : f32
    %20 = vector.broadcast %cst_15 : f32 to vector<8x256xf32>
    %21 = arith.mulf %19, %20 : vector<8x256xf32>
    %c0_16 = arith.constant 0 : index
    %c0_17 = arith.constant 0 : index
    %c0_18 = arith.constant 0 : index
    %22 = vector.load %arg8[%c0_16, %c0_17, %c0_18] : memref<1x8x256xf32, #tpu.memory_space<vmem>>, vector<1x8x256xf32>
    %23 = vector.shape_cast %22 : vector<1x8x256xf32> to vector<8x256xf32>
    %24 = vector.shape_cast %21 : vector<8x256xf32> to vector<1x8x256xf32>
    tpu.vector_store %arg8[%c0_16, %c0_17, %c0_18], %24 {strides = array<i32>} : memref<1x8x256xf32, #tpu.memory_space<vmem>>, vector<1x8x256xf32>,
    return
  }
  func.func @transform_0(%arg0: i32, %arg1: i32) -> (i32, i32, i32) {
    %c0_i32 = arith.constant 0 : i32
    %c0_i32_0 = arith.constant 0 : i32
    return %arg0, %c0_i32, %arg1 : i32, i32, i32
  }
  func.func @transform_1(%arg0: i32, %arg1: i32) -> (i32, i32) {
    %c0_i32 = arith.constant 0 : i32
    %c0_i32_0 = arith.constant 0 : i32
    %c0_i32_1 = arith.constant 0 : i32
    return %c0_i32, %c0_i32_0 : i32, i32
  }
  func.func @transform_2(%arg0: i32, %arg1: i32) -> (i32, i32) {
    %c0_i32 = arith.constant 0 : i32
    %c0_i32_0 = arith.constant 0 : i32
    %c0_i32_1 = arith.constant 0 : i32
    return %c0_i32, %c0_i32_0 : i32, i32
  }
  func.func @transform_3(%arg0: i32, %arg1: i32) -> (i32, i32) {
    %c0_i32 = arith.constant 0 : i32
    %c0_i32_0 = arith.constant 0 : i32
    %c0_i32_1 = arith.constant 0 : i32
    return %c0_i32, %c0_i32_0 : i32, i32
  }
  func.func @transform_4(%arg0: i32, %arg1: i32) -> (i32, i32) {
    %c0_i32 = arith.constant 0 : i32
    %c0_i32_0 = arith.constant 0 : i32
    %c0_i32_1 = arith.constant 0 : i32
    return %c0_i32, %c0_i32_0 : i32, i32
  }
  func.func @transform_5(%arg0: i32, %arg1: i32) -> (i32, i32, i32) {
    %c0_i32 = arith.constant 0 : i32
    %c0_i32_0 = arith.constant 0 : i32
    return %arg0, %c0_i32, %arg1 : i32, i32, i32
  }
  func.func @transform_6(%arg0: i32, %arg1: i32) -> (i32, i32, i32) {
    %c0_i32 = arith.constant 0 : i32
    %c0_i32_0 = arith.constant 0 : i32
    return %arg0, %c0_i32, %arg1 : i32, i32, i32
  }
}

</mosaic_0001>

<bundles_post_ra>
// kernel: tpu_custom_call.1
= control target key start
LH: loop header
LB: loop body
LE: loop exit
PB: predicated region body
PF: predicated region fallthrough
CT: control target
= control target key end

     0   :  { %11 = vsyncpa [#allocation3], 0  ;;  %s969_s0 = inlined_call_operand.vmem [shape: f32[2,4,256], index: 0, kind: input, shape index: {}]   ;;  %s970_s1 = inlined_call_operand.vmem [shape: f32[8,4], index: 1, kind: input, shape index: {}]   ;;  %s971_s2 = inlined_call_operand.vmem [shape: f32[8,4], index: 2, kind: input, shape index: {}]   ;;  %s972_s3 = inlined_call_operand.vmem [shape: f32[8,1], index: 3, kind: input, shape index: {}]   ;;  %s973_s4 = inlined_call_operand.vmem [shape: f32[8,1], index: 4, kind: input, shape index: {}]   ;;  %s974_s5 = inlined_call_operand.vmem [shape: f32[2,8,256], index: 5, kind: input, shape index: {}]   ;;  %s975_s6 = inlined_call_operand.hbm [shape: f32[2,8,256], index: 6, kind: output, shape index: {}]  }
   0x1   :  { %13 = vsyncpa [#allocation3 + $0x1], 0  ;;  %s834_s21 = smov 0   ;;  %s836_s22 = smov 0  }
   0x2   :  { %s838_s23 = smov 0   ;;  %s840_s24 = smov 0  }
   0x3   :  { %s842_s25 = smov 0   ;;  %s844_s26 = smov 0  }
   0x4 LB: > { %s629_s27 = sadd.s32 4294967295, %s794_s26   ;;  %s630_s28 = sadd.s32 4294967294, %s794_s26   ;;  %s794_s26 = sphi %s844_s26, %s19_s26   ;;  %s790_s25 = sphi %s842_s25, %s982_s25   ;;  %s786_s24 = sphi %s840_s24, %s981_s24   ;;  %s782_s23 = sphi %s838_s23, %s980_s23   ;;  %s778_s22 = sphi %s836_s22, %s979_s22   ;;  %s774_s21 = sphi %s834_s21, %s978_s21  }
   0x5   : > { %s31_s29 = sadd.s32 1, %s790_s25  ;;  %s180_s30 = sadd.s32 1, %s782_s23 }
   0x6   : > { %p33_p0 = scmp.ge.s32.totalorder %s31_s29, 2  ;;  %p190_p1 = scmp.ne.s32.totalorder %s782_s23, %s778_s22 }
   0x7   : > { %p191_p2 = scmp.eq.s32.totalorder %s629_s27, 1  ;;  %p196_p3 = scmp.ne.s32.totalorder %s778_s22, %s774_s21 }
   0x8   : > { %s984_s29 = smov (%p33_p0, %s31_s29), 0  ;;  %p197_p5 = scmp.eq.s32.totalorder %s630_s28, 1 }
   0x9   : > { %p874_p4 = por %p191_p2, %p190_p1  ;;  %s175_s8 = ssub.s32 %s790_s25, %s984_s29 }
   0xa   : > { %p633_p6 = scmp.ge.s32.totalorder %s794_s26, 1  ;;  %p178_p7 = scmp.eq.s32.totalorder %s175_s8, 0 }
   0xb   : > { %p881_p8 = por %p197_p5, %p196_p3  ;;  %p253_p9 = scmp.lt.s32.totalorder %s794_s26, 3 }
   0xc   : > { %s887_s10 = scalar_select %p178_p7, %s782_s23, %s180_s30  }
   0xd   : > { %p254_p10 = pnand %p633_p6, %p253_p9 }
   0xe   : > { %p297_p11 = scmp.lt.s32.totalorder (!%p254_p10), %s786_s24, 1  ;;  %v796_v0 = vmov (!%p254_p10), 0.0   ;;  %v410_v1 = vld [vmem:[%s973_s4] sm:$0xff] (!%p254_p10)  ;;  %v797_v2 = vmov (!%p254_p10), 0   ;;  %vm331_vm0 = vcmask (!%p254_p10), 1043456   ;;  %vm327_vm1 = vcmask (!%p254_p10), 31744  }
   0xf   : > { %257 = sbr.rel (%p254_p10) target bundleno = 283 (0x11b), region = 44  ;;  %400 = vmatprep.mubr.f32.mxu0 (!%p254_p10), %v796_v0  ;;  %489 = vmatprep.mubr.f32.mxu1 (!%p254_p10), %v796_v0  ;;  %v319_v3 = vld [vmem:[%s972_s3] sm:$0xff] (!%p254_p10)  ;;  %s293_s8 = sand.u32 (!%p254_p10), 1, %s778_s22  }
  0x10   : > { %710 = vset.pattern.permute.xlu0 (!%p254_p10), %v797_v2  ;;  %v318_v7 = vld [vmem:[%s970_s1] sm:$0xff] (!%p254_p10)  ;;  %s634_s12 = sshll.u32 (!%p254_p10), %s293_s8, 4  ;;  %s798_s30 = smov (!%p254_p10), [#allocation2]  }
  0x11   : > { %413 = vperm.xlu0 (!%p254_p10), %710, %v410_v1   ;;  %v409_v10 = vld [vmem:[%s971_s2] sm:$0xff] (!%p254_p10)  ;;  %s295_s17 = scalar_lea.vmem (!%p254_p10), [#allocation2], %s634_s12 }
  0x12   : > { %s535_s18 = sshll.u32 (!%p254_p10), %s295_s17, 4  ;;  %s922_s18 = int_to_ptr.vmem [resolvable:$true] %s535_s18 }
  0x13   : > { %s716_s28 = scalar_lea.vmem (!%p254_p10), %s922_s18, 256 }
  0x14   : > { %p717_p12 = scmp.ne.s32.totalorder (!%p254_p10), %s922_s18, %s716_s28 }
  0x15   : > { %322 = vperm.xlu0 (!%p254_p10), %710, %v319_v3  }
  0x16   : > { %s894_s13 = scalar_select %p297_p11, %s786_s24, 1 }
  0x17   : > { %p718_p13 = pnand %p717_p12, %p874_p4 }
  0x18   : > { %s650_s14 = sshll.u32 %s894_s13, 3  ;;  %s651_s11 = sshll.u32 %s894_s13, 4 }
  0x19   : > { %s304_s19 = scalar_lea.vmem %s969_s0, %s650_s14  ;;  %s314_s16 = scalar_lea.vmem %s974_s5, %s651_s11 }
  0x1a   : > { %v317_v4 = vld [vmem:[%s304_s19] sm:$0xff]  ;;  %v511_v26 = vld [vmem:[%s314_s16 + $0x8] sm:$0xff]  ;;  %s652_s13 = sshll.u32 %s786_s24, 8  ;;  %s519_s24 = scalar_lea.sflag [#allocation3], %s293_s8 }
  0x1b   : > { %v326_v5 = vcombine.high %v317_v4, %v317_v4  ;;  %v407_v6 = vmul.f32 %v317_v4, %v317_v4  ;;  %v510_v23 = vld [vmem:[%s314_s16] sm:$0xff]  ;;  %s920_s27 = scalar_lea.hbm %s975_s6, %s652_s13  ;;  %p719_p0 = pneg %p718_p13 }
  0x1c   : > { %s720_s11 = sshll.u32 %s798_s30, 4  ;;  %s721_s11 = int_to_ptr.vmem [resolvable:$false] %s720_s11 }
  0x1d   : > { %639 = vmatprep.subr.msk.mxu0 %vm331_vm0, %v326_v5  ;;  %v408_v8 = vmax.f32 %v407_v6, 0.0001  ;;  %s722_s12 = scalar_lea.vmem %s721_s11, 512  ;;  %p723_p1 = scmp.lt.s32.totalorder %s922_s18, %s721_s11 }
  0x1e   : > { %640 = vmatpush1.msk.msra.mxu0 %vm331_vm0, %v317_v4  ;;  %p724_p2 = scmp.lt.s32.totalorder %s722_s12, %s716_s28 }
  0x1f   : > { %v417_v9 = vcombine.high %v408_v8, %v408_v8  ;;  %641 = vmatmul.mubr.msk.f32.vlgmr.msra.gmra.mrb[0].mxu0 %vm327_vm1, %v318_v7 }
  0x20   : > { %p725_p3 = por %p724_p2, %p723_p1 }
  0x21   : > { %642 = vmatprep.subr.msk.mxu1 %vm331_vm0, %v417_v9 }
  0x22   : > { %643 = vmatpush1.msk.msra.mxu1 %vm331_vm0, %v408_v8  ;;  %p726_p5 = pnand %p725_p3, %p719_p0 }
  0x23   : > { %644 = vmatmul.mubr.msk.f32.vlgmr.msra.gmra.mrb[0].mxu1 %vm327_vm1, %v409_v10 }
  0x90   : > { %v414_v13 = vpop.permute.xlu0 %413 }
  0x94   : > { %v323_v21 = vpop.permute.xlu0 %322 }
  0xf2   : > { %v402_v11 = vpop.f32.mrb[0].mxu0 }
  0xf3   : > { %v404_v12 = vpop.f32.mrb[1].mxu0  ;;  %v403_v30 = vadd.f32 %v402_v11, %v323_v21 }
  0xf4   : > { %v405_v33 = vadd.f32 %v404_v12, %v323_v21 }
  0xf6   : > { %v491_v14 = vpop.f32.mrb[0].mxu1 }
  0xf7   : > { %v492_v15 = vadd.f32 %v491_v14, %v414_v13  ;;  %v493_v16 = vpop.f32.mrb[1].mxu1 }
  0xf8   : > { %v494_v17 = vadd.f32 %v493_v16, %v414_v13 }
  0xf9   : > { %712 = vrsqrt.f32 %v492_v15  ;;  %vm498_vm2 = vcmp.eq.f32.partialorder %v492_v15, inf  ;;  %v501_v22 = vand.u32 2147483648, %v492_v15  ;;  %vm500_vm3 = vcmp.eq.f32.partialorder %v492_v15, 0.0 }
  0xfa   : > { %714 = vrsqrt.f32 %v494_v17  ;;  %vm505_vm4 = vcmp.eq.f32.partialorder %v494_v17, inf  ;;  %v508_v27 = vand.u32 2147483648, %v494_v17  ;;  %vm507_vm5 = vcmp.eq.f32.partialorder %v494_v17, 0.0 }
 0x103   : > { %v713_v18 = vpop.eup %712 }
 0x104   : > { %v715_v19 = vpop.eup %714  ;;  %v497_v20 = vmul.f32 %v713_v18, %v492_v15 }
 0x105   : > { %v504_v24 = vmul.f32 %v715_v19, %v494_v17 }
 0x106   : > { %v499_v25 = vsel %vm498_vm2, %v492_v15, %v497_v20 }
 0x107   : > { %v502_v28 = vsel %vm500_vm3, %v501_v22, %v499_v25  ;;  %v506_v29 = vsel %vm505_vm4, %v494_v17, %v504_v24 }
 0x108   : > { %v512_v31 = vmul.f32 %v510_v23, %v502_v28  ;;  %v509_v32 = vsel %vm507_vm5, %v508_v27, %v506_v29 }
 0x109   : > { %v513_v34 = vmul.f32 %v511_v26, %v509_v32 }
 0x10a   : > { %v514_v35 = vadd.f32 %v512_v31, %v403_v30 }
 0x10b   : > { %v515_v36 = vadd.f32 %v513_v34, %v405_v33 }
 0x10c   : > { %516 = vst [vmem:[%s295_s17] sm:$0xff] %v514_v35 }
 0x10d   : > { %517 = vst [vmem:[%s295_s17 + $0x8] sm:$0xff] %v515_v36 }
 0x10e   : > { %729 = shalt.err (!%p726_p5)
}
 0x10f   : > { %s730_s8 = scalar_lea.hbm %s920_s27, 256  ;;  %s734_s16 = scalar_lea.hbm %s975_s6, 512 }
 0x110   : > { %p731_p6 = scmp.ne.s32.totalorder %s920_s27, %s730_s8  ;;  %p735_p10 = scmp.lt.u32.totalorder %s920_s27, %s975_s6 }
 0x111   : > { %p736_p11 = scmp.lt.u32.totalorder %s734_s16, %s730_s8  ;;  %p738_p13 = scmp.lt.u32.totalorder %s730_s8, %s920_s27 }
 0x112   : > { %p732_p7 = pnand %p731_p6, %p874_p4 }
 0x113   : > { %p737_p12 = por %p736_p11, %p735_p10 }
 0x114   : > { %p733_p9 = pneg %p732_p7 }
 0x115   : > { %p739_p0 = por %p738_p13, %p737_p12 }
 0x117   : > { %p740_p1 = pnand %p739_p0, %p733_p9 }
 0x119   : > { %743 = shalt.err (!%p740_p1)
}
 0x11a   : > { %653 = dma.vmem_to_hbm [thread:$0]  (%p874_p4), %s922_s18, 256, %s920_s27, %s519_s24  }
 0x11b PF: > { %p659_p2 = scmp.ge.s32.totalorder %s794_s26, 2  ;;  %s547_s19 = sand.u32 1, %s774_s21  }
 0x11c   : > { %s548_s20 = scalar_lea.sflag [#allocation3], %s547_s19 }
 0x11d   : > { %p656_p3 = pnand %p659_p2, %p881_p8 }
 0x11f   : > { %769 = dma.done.wait (!%p656_p3), %s548_s20, 256  }
 0x120   : > { %771 = vsyncadd (!%p656_p3), %s548_s20, 4294967040  ;;  %s19_s26 = sadd.s32 1, %s794_s26   ;;  %s978_s21 = smov %s778_s22 }
 0x121   : > { %p16_p5 = scmp.ge.s32.totalorder %s19_s26, 4   ;;  %s979_s22 = smov %s782_s23 }
 0x122   : > { %s980_s23 = smov %s887_s10  ;;  %s981_s24 = smov %s790_s25 }
 0x123   : > { %s982_s25 = smov %s984_s29  ;;  %18 = sbr.rel (!%p16_p5) target bundleno = 4 (0x4), region = 82 }
 0x12a   :  { %553 = vsyncpa [#allocation3], 1 }
 0x12b   :  { %555 = vsyncpa [#allocation3 + $0x1], 1 }

</bundles_post_ra>
